<compile_context>
chip_gen: v6e
topology: v6e:2x2x1
jax: 0.10.0
libtpu: 0.0.40
codegen_flags: <defaults>
</compile_context>

<pallas_src>
import functools

import jax
import jax.numpy as jnp
from jax import lax
from jax.experimental import pallas as pl
from jax.experimental.pallas import tpu as pltpu


def se_kernel(x_ref, w1_ref, b1_ref, w2_ref, b2_ref, o_ref, *, inv_hw, use_mxu):
    # x_ref: (NB, C, HW)   w1_ref: (C_sq, C)  b1_ref: (1, C_sq)
    # w2_ref: (C, C_sq)    b2_ref: (1, C)     o_ref: (NB, C, HW)

    # --- AdaptiveAvgPool2d((1,1)): global spatial mean, accumulated in f32.
    pooled = jnp.sum(x_ref[...].astype(jnp.float32), axis=-1) * inv_hw   # (NB, C)

    w1 = w1_ref[...].astype(jnp.float32)
    b1 = b1_ref[...].astype(jnp.float32)
    w2 = w2_ref[...].astype(jnp.float32)
    b2 = b2_ref[...].astype(jnp.float32)

    # --- 1x1 conv (C -> C_sq) + SiLU.
    if use_mxu:
        # MXU is idle in this kernel -> matvecs are free filler in the ve slot.
        s = lax.dot_general(pooled, w1, (((1,), (1,)), ((), ())),
                            preferred_element_type=jnp.float32) + b1
    else:
        # Tiny channels: VPU broadcast-mul + cross-lane sum, skip the MXU.
        s = jnp.sum(pooled[:, None, :] * w1[None, :, :], axis=-1) + b1
    s = s * jax.nn.sigmoid(s)                                            # (NB, C_sq)

    # --- 1x1 conv (C_sq -> C) + Sigmoid.
    if use_mxu:
        scale = lax.dot_general(s, w2, (((1,), (1,)), ((), ())),
                                preferred_element_type=jnp.float32) + b2
    else:
        scale = jnp.sum(s[:, None, :] * w2[None, :, :], axis=-1) + b2
    scale = jax.nn.sigmoid(scale)                                        # (NB, C)

    # --- scale * x: re-read x_ref from VMEM (don't keep block live in vregs).
    o_ref[...] = (x_ref[...].astype(jnp.float32)
                  * scale[:, :, None]).astype(o_ref.dtype)


def _vmem_capacity_bytes():
    try:
        return int(pltpu.get_tpu_info().vmem_capacity_bytes)
    except Exception:
        return 128 * 1024 * 1024


def _pick_batch_block(n, per_sample_bytes, target_bytes, min_steps):
    """Largest NB whose block fits target_bytes, keeping >= min_steps grid steps
    when n allows. NB need NOT divide n (grid uses pl.cdiv)."""
    nb = max(1, min(n, int(target_bytes // max(1, per_sample_bytes))))
    if n >= min_steps:
        nb = min(nb, max(1, n // min_steps))
    return nb


def squeeze_excitation(x_nchw, w1, b1, w2, b2, *, block_bytes=None):
    """x_nchw: (N, C_expand, H, W) float32/bfloat16. Returns same shape/dtype."""
    N, C, H, W = x_nchw.shape
    HW = H * W
    C_sq = w1.shape[0]

    # Free metadata reshape (contiguous NCHW -> N, C, HW). No padding, no slice.
    x = x_nchw.reshape(N, C, HW)
    b1c = b1.reshape(1, C_sq)
    b2c = b2.reshape(1, C)

    itemsize = x.dtype.itemsize
    per_sample_bytes = C * HW * itemsize
    weights_bytes = (w1.size + w2.size + C + C_sq) * itemsize

    # Generation-aware sizing: v7x has 64 MiB VMEM / TC and 2 TCs that the
    # "parallel" batch axis shards across; v5e/v6e have 128 MiB VMEM, 1 TC.
    vmem_cap = _vmem_capacity_bytes()
    if vmem_cap <= 64 * 1024 * 1024:                    # v7x-class
        target_block = 6 * 1024 * 1024 if block_bytes is None else block_bytes
        vmem_limit = 40 * 1024 * 1024
        min_steps = 4                                   # >= 2 steps per core
    else:                                               # v5e / v6e
        target_block = 12 * 1024 * 1024 if block_bytes is None else block_bytes
        vmem_limit = 64 * 1024 * 1024
        min_steps = 2

    NB = _pick_batch_block(N, per_sample_bytes, target_block, min_steps)
    grid = (pl.cdiv(N, NB),)                            # ragged last block OK

    # Ensure double-buffered in+out blocks (+ weights, headroom) fit the budget.
    needed = 4 * NB * per_sample_bytes + 2 * weights_bytes + (2 << 20)
    vmem_limit = min(max(vmem_limit, needed), vmem_cap)

    # MXU route only pays off for realistic SE channel counts.
    use_mxu = (C >= 128) and (C_sq >= 8) and (NB >= 8)

    kernel = functools.partial(se_kernel, inv_hw=1.0 / HW, use_mxu=use_mxu)

    cost = pl.CostEstimate(
        flops=2 * N * C * HW,
        transcendentals=N * (C_sq + C),
        bytes_accessed=2 * N * C * HW * itemsize + weights_bytes,
    )

    out = pl.pallas_call(
        kernel,
        out_shape=jax.ShapeDtypeStruct((N, C, HW), x.dtype),
        grid_spec=pltpu.PrefetchScalarGridSpec(
            num_scalar_prefetch=0,
            grid=grid,
            in_specs=[
                pl.BlockSpec((NB, C, HW), lambda n: (n, 0, 0)),
                pl.BlockSpec((C_sq, C), lambda n: (0, 0)),
                pl.BlockSpec((1, C_sq), lambda n: (0, 0)),
                pl.BlockSpec((C, C_sq), lambda n: (0, 0)),
                pl.BlockSpec((1, C), lambda n: (0, 0)),
            ],
            out_specs=pl.BlockSpec((NB, C, HW), lambda n: (n, 0, 0)),
        ),
        compiler_params=pltpu.CompilerParams(
            dimension_semantics=("parallel",),
            vmem_limit_bytes=int(vmem_limit),
        ),
        cost_estimate=cost,
    )(x, w1, b1c, w2, b2c)

    return out.reshape(N, C, H, W)


def reference_se(x, w1, b1, w2, b2):
    # Pure-JAX reference matching the PyTorch module semantics (NCHW).
    pooled = jnp.mean(x, axis=(2, 3))                       # (N, C)
    s = pooled @ w1.T + b1                                  # (N, C_sq)
    s = s * jax.nn.sigmoid(s)                               # SiLU
    scale = jax.nn.sigmoid(s @ w2.T + b2)                   # (N, C)
    return scale[:, :, None, None] * x


if __name__ == "__main__":
    # Module config: channel_input=8, channel_expand=16, squeeze_factor=4
    #   -> channel_squeeze = 8 // 4 = 2
    channel_input = 8
    channel_expand = 16
    squeeze_factor = 4
    channel_squeeze = channel_input // squeeze_factor

    key = jax.random.PRNGKey(0)
    kx, k1, k2, k3, k4, kx2, kx3 = jax.random.split(key, 7)

    w1 = jax.random.normal(k1, (channel_squeeze, channel_expand),
                           dtype=jnp.float32) * 0.1
    b1 = jax.random.normal(k2, (channel_squeeze,), dtype=jnp.float32) * 0.1
    w2 = jax.random.normal(k3, (channel_expand, channel_squeeze),
                           dtype=jnp.float32) * 0.1
    b2 = jax.random.normal(k4, (channel_expand,), dtype=jnp.float32) * 0.1

    # Case 1: f32, HW multiple of 128 (16x16), multi-step batch grid.
    N, H, W = 8, 16, 16
    x = jax.random.normal(kx, (N, channel_expand, H, W), dtype=jnp.float32)
    out = jax.block_until_ready(squeeze_excitation(x, w1, b1, w2, b2))
    ref = reference_se(x, w1, b1, w2, b2)
    assert out.shape == x.shape and out.dtype == x.dtype
    assert jnp.allclose(out, ref, atol=1e-5, rtol=1e-5)

    # Case 2: f32, typical EfficientNet spatial 14x14 (HW=196, not a multiple
    # of 128) and odd N -> exercises full-extent last dim + ragged last block.
    N2, H2, W2 = 5, 14, 14
    x2 = jax.random.normal(kx2, (N2, channel_expand, H2, W2), dtype=jnp.float32)
    out2 = jax.block_until_ready(squeeze_excitation(x2, w1, b1, w2, b2))
    ref2 = reference_se(x2, w1, b1, w2, b2)
    assert out2.shape == x2.shape
    assert jnp.allclose(out2, ref2, atol=1e-5, rtol=1e-5)

    # Case 3: bf16 activations (f32 accumulation inside the kernel).
    N3, H3, W3 = 4, 16, 16
    x3f = jax.random.normal(kx3, (N3, channel_expand, H3, W3), dtype=jnp.float32)
    x3 = x3f.astype(jnp.bfloat16)
    out3 = jax.block_until_ready(squeeze_excitation(x3, w1, b1, w2, b2))
    ref3 = reference_se(x3.astype(jnp.float32), w1, b1, w2, b2)
    assert out3.shape == x3.shape and out3.dtype == jnp.bfloat16
    assert jnp.allclose(out3.astype(jnp.float32), ref3, atol=3e-2, rtol=3e-2)

    print("KERNEL_OK")
</pallas_src>

<mosaic_0001>
module attributes {stable_mosaic.version = 11 : i64} {
  func.func @se_kernel(%arg0: i32, %arg1: memref<4x16x256xf32, #tpu.memory_space<vmem>>, %arg2: memref<2x16xf32, #tpu.memory_space<vmem>>, %arg3: memref<1x2xf32, #tpu.memory_space<vmem>>, %arg4: memref<16x2xf32, #tpu.memory_space<vmem>>, %arg5: memref<1x16xf32, #tpu.memory_space<vmem>>, %arg6: memref<4x16x256xf32, #tpu.memory_space<vmem>>) attributes {dimension_semantics = [#tpu.dimension_semantics<parallel>], iteration_bounds = array<i64: 2>, scalar_prefetch = 0 : i64, scratch_operands = 0 : i64, tpu.core_type = #tpu.core_type<tc>, window_params = [{transform_indices = @transform_0, window_bounds = array<i64: 4, 16, 256>}, {pipeline_mode = #tpu.pipeline_mode<synchronous>, transform_indices = @transform_1, window_bounds = array<i64: 2, 16>}, {pipeline_mode = #tpu.pipeline_mode<synchronous>, transform_indices = @transform_2, window_bounds = array<i64: 1, 2>}, {pipeline_mode = #tpu.pipeline_mode<synchronous>, transform_indices = @transform_3, window_bounds = array<i64: 16, 2>}, {pipeline_mode = #tpu.pipeline_mode<synchronous>, transform_indices = @transform_4, window_bounds = array<i64: 1, 16>}, {transform_indices = @transform_5, window_bounds = array<i64: 4, 16, 256>}]} {
    %c0 = arith.constant 0 : index
    %c0_0 = arith.constant 0 : index
    %c0_1 = arith.constant 0 : index
    %0 = vector.load %arg1[%c0, %c0_0, %c0_1] : memref<4x16x256xf32, #tpu.memory_space<vmem>>, vector<4x16x256xf32>
    %cst = arith.constant dense<0.000000e+00> : vector<4x16xf32>
    %1 = vector.multi_reduction <add>, %0, %cst [2] : vector<4x16x256xf32> to vector<4x16xf32>
    %cst_2 = arith.constant 3.906250e-03 : f32
    %2 = vector.broadcast %cst_2 : f32 to vector<4x16xf32>
    %3 = arith.mulf %1, %2 : vector<4x16xf32>
    %c0_3 = arith.constant 0 : index
    %c0_4 = arith.constant 0 : index
    %4 = vector.load %arg2[%c0_3, %c0_4] : memref<2x16xf32, #tpu.memory_space<vmem>>, vector<2x16xf32>
    %c0_5 = arith.constant 0 : index
    %c0_6 = arith.constant 0 : index
    %5 = vector.load %arg3[%c0_5, %c0_6] : memref<1x2xf32, #tpu.memory_space<vmem>>, vector<1x2xf32>
    %c0_7 = arith.constant 0 : index
    %c0_8 = arith.constant 0 : index
    %6 = vector.load %arg4[%c0_7, %c0_8] : memref<16x2xf32, #tpu.memory_space<vmem>>, vector<16x2xf32>
    %c0_9 = arith.constant 0 : index
    %c0_10 = arith.constant 0 : index
    %7 = vector.load %arg5[%c0_9, %c0_10] : memref<1x16xf32, #tpu.memory_space<vmem>>, vector<1x16xf32>
    %8 = vector.shape_cast %3 : vector<4x16xf32> to vector<4x1x16xf32>
    %9 = vector.shape_cast %4 : vector<2x16xf32> to vector<1x2x16xf32>
    %10 = vector.broadcast %8 : vector<4x1x16xf32> to vector<4x2x16xf32>
    %11 = vector.broadcast %9 : vector<1x2x16xf32> to vector<4x2x16xf32>
    %12 = arith.mulf %10, %11 : vector<4x2x16xf32>
    %cst_11 = arith.constant dense<0.000000e+00> : vector<4x2xf32>
    %13 = vector.multi_reduction <add>, %12, %cst_11 [2] : vector<4x2x16xf32> to vector<4x2xf32>
    %14 = vector.broadcast %5 : vector<1x2xf32> to vector<4x2xf32>
    %15 = arith.addf %13, %14 : vector<4x2xf32>
    %16 = arith.negf %15 : vector<4x2xf32>
    %17 = math.exp %16 : vector<4x2xf32>
    %cst_12 = arith.constant 1.000000e+00 : f32
    %18 = vector.broadcast %cst_12 : f32 to vector<4x2xf32>
    %19 = arith.addf %18, %17 : vector<4x2xf32>
    %20 = arith.divf %18, %19 : vector<4x2xf32>
    %21 = arith.mulf %15, %20 : vector<4x2xf32>
    %22 = vector.shape_cast %21 : vector<4x2xf32> to vector<4x1x2xf32>
    %23 = vector.shape_cast %6 : vector<16x2xf32> to vector<1x16x2xf32>
    %24 = vector.broadcast %22 : vector<4x1x2xf32> to vector<4x16x2xf32>
    %25 = vector.broadcast %23 : vector<1x16x2xf32> to vector<4x16x2xf32>
    %26 = arith.mulf %24, %25 : vector<4x16x2xf32>
    %cst_13 = arith.constant dense<0.000000e+00> : vector<4x16xf32>
    %27 = vector.multi_reduction <add>, %26, %cst_13 [2] : vector<4x16x2xf32> to vector<4x16xf32>
    %28 = vector.broadcast %7 : vector<1x16xf32> to vector<4x16xf32>
    %29 = arith.addf %27, %28 : vector<4x16xf32>
    %30 = arith.negf %29 : vector<4x16xf32>
    %31 = math.exp %30 : vector<4x16xf32>
    %cst_14 = arith.constant 1.000000e+00 : f32
    %32 = vector.broadcast %cst_14 : f32 to vector<4x16xf32>
    %33 = arith.addf %32, %31 : vector<4x16xf32>
    %34 = arith.divf %32, %33 : vector<4x16xf32>
    %c0_15 = arith.constant 0 : index
    %c0_16 = arith.constant 0 : index
    %c0_17 = arith.constant 0 : index
    %35 = vector.load %arg1[%c0_15, %c0_16, %c0_17] : memref<4x16x256xf32, #tpu.memory_space<vmem>>, vector<4x16x256xf32>
    %36 = vector.shape_cast %34 : vector<4x16xf32> to vector<4x16x1xf32>
    %37 = vector.broadcast %36 : vector<4x16x1xf32> to vector<4x16x256xf32>
    %38 = arith.mulf %35, %37 : vector<4x16x256xf32>
    %c0_18 = arith.constant 0 : index
    %c0_19 = arith.constant 0 : index
    %c0_20 = arith.constant 0 : index
    %39 = vector.load %arg6[%c0_18, %c0_19, %c0_20] : memref<4x16x256xf32, #tpu.memory_space<vmem>>, vector<4x16x256xf32>
    tpu.vector_store %arg6[%c0_18, %c0_19, %c0_20], %38 {strides = array<i32>} : memref<4x16x256xf32, #tpu.memory_space<vmem>>, vector<4x16x256xf32>,
    return
  }
  func.func @transform_0(%arg0: i32) -> (i32, i32, i32) {
    %c0_i32 = arith.constant 0 : i32
    %c0_i32_0 = arith.constant 0 : i32
    %c0_i32_1 = arith.constant 0 : i32
    return %arg0, %c0_i32, %c0_i32_0 : i32, i32, i32
  }
  func.func @transform_1(%arg0: i32) -> (i32, i32) {
    %c0_i32 = arith.constant 0 : i32
    %c0_i32_0 = arith.constant 0 : i32
    %c0_i32_1 = arith.constant 0 : i32
    return %c0_i32, %c0_i32_0 : i32, i32
  }
  func.func @transform_2(%arg0: i32) -> (i32, i32) {
    %c0_i32 = arith.constant 0 : i32
    %c0_i32_0 = arith.constant 0 : i32
    %c0_i32_1 = arith.constant 0 : i32
    return %c0_i32, %c0_i32_0 : i32, i32
  }
  func.func @transform_3(%arg0: i32) -> (i32, i32) {
    %c0_i32 = arith.constant 0 : i32
    %c0_i32_0 = arith.constant 0 : i32
    %c0_i32_1 = arith.constant 0 : i32
    return %c0_i32, %c0_i32_0 : i32, i32
  }
  func.func @transform_4(%arg0: i32) -> (i32, i32) {
    %c0_i32 = arith.constant 0 : i32
    %c0_i32_0 = arith.constant 0 : i32
    %c0_i32_1 = arith.constant 0 : i32
    return %c0_i32, %c0_i32_0 : i32, i32
  }
  func.func @transform_5(%arg0: i32) -> (i32, i32, i32) {
    %c0_i32 = arith.constant 0 : i32
    %c0_i32_0 = arith.constant 0 : i32
    %c0_i32_1 = arith.constant 0 : i32
    return %arg0, %c0_i32, %c0_i32_0 : i32, i32, i32
  }
}

</mosaic_0001>

<bundles_post_ra>
// kernel: tpu_custom_call.1
= control target key start
LH: loop header
LB: loop body
LE: loop exit
PB: predicated region body
PF: predicated region fallthrough
CT: control target
= control target key end

     0   :  { %10 = vsyncpa [#allocation3], 0  ;;  %s2442_s0 = inlined_call_operand.hbm [shape: f32[8,16,256], index: 0, kind: input, shape index: {}]   ;;  %s2443_s1 = inlined_call_operand.vmem [shape: f32[2,16], index: 1, kind: input, shape index: {}]   ;;  %s2444_s2 = inlined_call_operand.vmem [shape: f32[1,2], index: 2, kind: input, shape index: {}]   ;;  %s2445_s3 = inlined_call_operand.vmem [shape: f32[16,2], index: 3, kind: input, shape index: {}]   ;;  %s2446_s4 = inlined_call_operand.vmem [shape: f32[1,16], index: 4, kind: input, shape index: {}]   ;;  %s2447_s5 = inlined_call_operand.hbm [shape: f32[8,16,256], index: 5, kind: output, shape index: {}]  }
   0x1   :  { %12 = vsyncpa [#allocation3 + $0x1], 0 }
   0x2   :  { %13 = vsyncpa [#allocation4], 0 }
   0x3   :  { %15 = vsyncpa [#allocation4 + $0x1], 0  ;;  %s1858_s18 = smov 0   ;;  %s1860_s19 = smov 0  }
   0x4   :  { %s1862_s20 = smov 0   ;;  %s1864_s21 = smov 0  }
   0x5 LB: > { %s1879_s22 = sadd.s32 4294967295, %s1819_s21   ;;  %s1576_s23 = sadd.s32 4294967294, %s1819_s21   ;;  %s1819_s21 = sphi %s1864_s21, %s2462_s21   ;;  %s1815_s20 = sphi %s1862_s20, %s2461_s20   ;;  %s1811_s19 = sphi %s1860_s19, %s2460_s19   ;;  %s1807_s18 = sphi %s1858_s18, %s2459_s18  }
   0x6   : > { %s1883_s24 = sadd.s32 1, %s1819_s21   ;;  %s28_s25 = sadd.s32 1, %s1815_s20 }
   0x7   : > { %s25_s26 = ssub.s32 %s1819_s21, %s1883_s24  ;;  %p35_p0 = scmp.ne.s32.totalorder %s1815_s20, %s1811_s19 }
   0x8   : > { %p26_p1 = scmp.eq.s32.totalorder %s25_s26, 0  ;;  %p36_p2 = scmp.eq.s32.totalorder %s1819_s21, 0 }
   0x9   : > { %p41_p3 = scmp.ne.s32.totalorder %s1811_s19, %s1807_s18  ;;  %p42_p4 = scmp.eq.s32.totalorder %s1879_s22, 0 }
   0xa   : > { %s1895_s27 = scalar_select %p26_p1, %s1815_s20, %s28_s25  }
   0xb   : > { %p1897_p5 = por %p36_p2, %p35_p0  ;;  %p1901_p6 = por %p42_p4, %p41_p3 }
   0xc   : > { %p149_p7 = scmp.eq.s32.totalorder %s1879_s22, 1  ;;  %p155_p8 = scmp.eq.s32.totalorder %s1576_s23, 1 }
   0xd   : > { %s2451_s29 = scalar_select %p1901_p6, 1, 0 }
   0xe   : > { %p1622_p10 = scmp.lt.s32.totalorder %s1819_s21, 2  ;;  %p1908_p11 = por %p149_p7, %p35_p0 }
   0xf   : > { %p1912_p12 = por %p155_p8, %p41_p3  ;;  %s187_s7 = sand.u32 1, %s1815_s20  }
  0x10   : > { %s2452_s30 = scalar_select %p1908_p11, 1, 0 }
  0x11   : > { %s2453_s6 = scalar_select %p1912_p12, 1, 0 }
  0x12   : > { %s1607_s8 = sshll.u32 %s1819_s21, 11  ;;  %s1579_s9 = sshll.u32 %s187_s7, 7 }
  0x13   : > { %s1921_s12 = scalar_lea.hbm %s2442_s0, %s1607_s8  ;;  %s191_s13 = scalar_lea.vmem [#allocation2], %s1579_s9 }
  0x14   : > { %s199_s14 = sshll.u32 %s191_s13, 4  ;;  %p1925_p13 = pnand %p1622_p10, %p1897_p5  ;;  %s1929_s14 = int_to_ptr.vmem [resolvable:$true] %s199_s14 }
  0x15   : > { %s1931_s16 = scalar_lea.sflag [#allocation3], %s187_s7  ;;  %s1727_s17 = scalar_lea.hbm %s1921_s12, 2048 }
  0x16   : > { %p1728_p0 = scmp.ne.s32.totalorder %s1921_s12, %s1727_s17  ;;  %p1729_p1 = pneg %p1925_p13 }
  0x17   : > { %s1732_s26 = scalar_lea.hbm %s2442_s0, 4096  ;;  %p1733_p4 = scmp.lt.s32.totalorder %s1921_s12, %s2442_s0 }
  0x18   : > { %p1730_p2 = pnand %p1729_p1, %p1728_p0  ;;  %p1734_p5 = scmp.lt.s32.totalorder %s1732_s26, %s1727_s17 }
  0x1a   : > { %p1731_p3 = pneg %p1730_p2  ;;  %p1735_p7 = por %p1734_p5, %p1733_p4 }
  0x1c   : > { %p1736_p8 = pnand %p1735_p7, %p1731_p3 }
  0x1e   : > { %1739 = shalt.err (!%p1736_p8)
}
  0x1f   : > { %s1740_s7 = scalar_lea.vmem %s1929_s14, 2048  ;;  %s1821_s9 = smov [#allocation2]  }
  0x20   : > { %p1741_p10 = scmp.ne.s32.totalorder %s1929_s14, %s1740_s7  ;;  %s1745_s10 = sshll.u32 %s1821_s9, 4  ;;  %s1746_s10 = int_to_ptr.vmem [resolvable:$false] %s1745_s10 }
  0x21   : > { %s1747_s11 = scalar_lea.vmem %s1746_s10, 4096  ;;  %p1748_p2 = scmp.lt.s32.totalorder %s1929_s14, %s1746_s10 }
  0x22   : > { %p1743_p9 = pnand %p1741_p10, %p1729_p1  ;;  %p1749_p12 = scmp.lt.s32.totalorder %s1747_s11, %s1740_s7 }
  0x24   : > { %p1744_p0 = pneg %p1743_p9  ;;  %p1750_p11 = por %p1749_p12, %p1748_p2 }
  0x26   : > { %p1751_p6 = pnand %p1750_p11, %p1744_p0 }
  0x28   : > { %1754 = shalt.err (!%p1751_p6)
}
  0x29   : > { %s1822_s13 = smov 256   ;;  %s1823_s17 = smov 16  }
  0x2a   : > { %1617 = dma.hbm_to_vmem [thread:$0]  (!%p1925_p13), %s1921_s12, 2048, %s1929_s14, %s1931_s16, %s1822_s13, %s1822_s13, %s1823_s17  }
  0x2b   : > { %p1583_p9 = scmp.ge.s32.totalorder %s1819_s21, 1  ;;  %p207_p1 = scmp.lt.s32.totalorder %s1819_s21, 3 }
  0x2d   : > { %p208_p3 = pnand %p1583_p9, %p207_p1 }
  0x2e   : > { %s1955_s23 = sand.u32 (!%p208_p3), 1, %s1811_s19   ;;  %p2455_p6 = scmp.ne.s32.totalorder (!%p208_p3), %s2451_s29, 0 }
  0x2f   : > { %211 = sbr.rel (%p208_p3) target bundleno = 1113 (0x459), region = 40  ;;  %s1584_s25 = sshll.u32 (!%p208_p3), %s1955_s23, 7 }
  0x30   : > { %s214_s26 = scalar_lea.sflag (!%p208_p3), [#allocation3], %s1955_s23  ;;  %s1961_s28 = scalar_lea.vmem (!%p208_p3), [#allocation2], %s1584_s25 }
  0x34   : > { %1798 = dma.done.wait (%p2455_p6), %s214_s26, 2048  }
  0x35   : > { %1800 = vsyncadd (%p2455_p6), %s214_s26, 4294965248  ;;  %v250_v0 = vld [vmem:[%s1961_s28 + $0x20] sm:$0xff]  ;;  %v251_v1 = vld [vmem:[%s1961_s28 + $0x28] sm:$0xff]  ;;  %v300_v24 = vlaneseq  ;;  %v1824_v30 = vmov 0   ;;  %vm417_vm0 = vcmask 130112   ;;  %vm482_vm1 = vcmask 1041409  }
  0x36   : > { %v246_v2 = vld [vmem:[%s1961_s28] sm:$0xff]  ;;  %v268_v3 = vadd.f32 %v251_v1, %v250_v0  ;;  %v247_v4 = vld [vmem:[%s1961_s28 + $0x8] sm:$0xff]  ;;  %v252_v5 = vld [vmem:[%s1961_s28 + $0x30] sm:$0xff]  ;;  %1662 = vset.pattern.permute.xlu1 %v1824_v30  ;;  %1661 = vset.pattern.permute.xlu0 %v1824_v30  ;;  %vm491_vm2 = vcmask 123904   ;;  %vm1252_vm3 = vcmask 1042434   ;;  %vm1254_vm4 = vcmask 1043459  }
  0x37   : > { %v253_v6 = vld [vmem:[%s1961_s28 + $0x38] sm:$0xff]  ;;  %v262_v7 = vadd.f32 %v247_v4, %v246_v2  ;;  %v248_v8 = vld [vmem:[%s1961_s28 + $0x10] sm:$0xff]  ;;  %v254_v14 = vld [vmem:[%s1961_s28 + $0x40] sm:$0xff]  ;;  %v1984_v25 = vshrl.u32 %v300_v24, 7  ;;  %vm1256_vm5 = vcmask 1044484   ;;  %vm1258_vm6 = vcmask 1045509  }
  0x38   : > { %v249_v9 = vld [vmem:[%s1961_s28 + $0x18] sm:$0xff]  ;;  %269 = vadd.xlane.f32.xlu1 %v268_v3  ;;  %v271_v10 = vadd.f32 %v253_v6, %v252_v5  ;;  %v256_v12 = vld [vmem:[%s1961_s28 + $0x50] sm:$0xff]  ;;  %v255_v15 = vld [vmem:[%s1961_s28 + $0x48] sm:$0xff]  ;;  %vm1260_vm7 = vcmask 1046534   ;;  %vm1262_vm8 = vcmask 1047559   ;;  %vm1321_vm9 = vcmask 15360  }
  0x39   : > { %263 = vadd.xlane.f32.xlu0 %v262_v7  ;;  %v265_v11 = vadd.f32 %v249_v9, %v248_v8  ;;  %v257_v13 = vld [vmem:[%s1961_s28 + $0x58] sm:$0xff]  ;;  %v274_v17 = vadd.f32 %v255_v15, %v254_v14  ;;  %v260_v18 = vld [vmem:[%s1961_s28 + $0x70] sm:$0xff]  ;;  %v258_v20 = vld [vmem:[%s1961_s28 + $0x60] sm:$0xff]  ;;  %v302_v26 = vsub.s32 0, %v1984_v25  ;;  %v313_v29 = vsub.s32 1, %v1984_v25  ;;  %s2362_s13 = scalar_lea.vmem [#allocation5], %s1584_s25 }
  0x3a   : > { %v277_v16 = vadd.f32 %v257_v13, %v256_v12  ;;  %v261_v19 = vld [vmem:[%s1961_s28 + $0x78] sm:$0xff]  ;;  %v259_v21 = vld [vmem:[%s1961_s28 + $0x68] sm:$0xff]  ;;  %v294_v27 = vld [vmem:[%s2443_s1] sm:$0x3]  ;;  %v577_v34 = vsub.s32 4, %v1984_v25  ;;  %v591_v37 = vsub.s32 6, %v1984_v25 }
  0x3b   : > { %v283_v22 = vadd.f32 %v261_v19, %v260_v18  ;;  %v280_v23 = vadd.f32 %v259_v21, %v258_v20  ;;  %v303_v28 = vrot.slane %v294_v27, %v302_v26  ;;  %v314_v31 = vrot.slane %v294_v27, %v313_v29  ;;  %v296_v32 = vld [vmem:[%s2445_s3] sm:$0xff]  ;;  %v297_v41 = vld [vmem:[%s2445_s3 + $0x8] sm:$0xff]  ;;  %s1609_s17 = sshll.u32 %s1879_s22, 11  ;;  %s1503_s25 = sshll.u32 %s2362_s13, 4  ;;  %s2395_s25 = int_to_ptr.vmem [resolvable:$true] %s1503_s25 }
  0x3c   : > { %272 = vadd.xlane.f32.xlu1 %v271_v10  ;;  %v550_v33 = vrot.slane %v296_v32, %v302_v26  ;;  %v1586_v35 = vld [vmem:[%s2444_s2] ss:$0 sm:$0xff]  ;;  %v578_v36 = vrot.slane %v296_v32, %v577_v34  ;;  %v557_v38 = vrot.slane %v296_v32, %v313_v29  ;;  %v563_v39 = vsub.s32 2, %v1984_v25  ;;  %s2393_s12 = scalar_lea.hbm %s2447_s5, %s1609_s17  ;;  %s1489_s22 = scalar_lea.sflag [#allocation4], %s1955_s23 }
  0x3d   : > { %266 = vadd.xlane.f32.xlu0 %v265_v11  ;;  %v592_v40 = vrot.slane %v296_v32, %v591_v37  ;;  %v570_v43 = vsub.s32 3, %v1984_v25  ;;  %v606_v44 = vrot.slane %v297_v41, %v302_v26  ;;  %v584_v46 = vsub.s32 5, %v1984_v25  ;;  %s1755_s14 = scalar_lea.vmem %s2395_s25, 2048  ;;  %p2456_p12 = scmp.ne.s32.totalorder %s2452_s30, 0 }
  0x3e   : > { %v564_v42 = vrot.slane %v296_v32, %v563_v39  ;;  %v620_v47 = vrot.slane %v297_v41, %v563_v39  ;;  %v598_v49 = vsub.s32 7, %v1984_v25  ;;  %v634_v50 = vrot.slane %v297_v41, %v577_v34  ;;  %p1756_p11 = scmp.ne.s32.totalorder %s2395_s25, %s1755_s14  ;;  %s1825_s15 = smov [#allocation5]  }
  0x3f   : > { %v571_v45 = vrot.slane %v296_v32, %v570_v43  ;;  %v585_v48 = vrot.slane %v296_v32, %v584_v46  ;;  %v648_v51 = vrot.slane %v297_v41, %v591_v37  ;;  %v613_v53 = vrot.slane %v297_v41, %v313_v29  ;;  %s1759_s16 = sshll.u32 %s1825_s15, 4  ;;  %s1760_s16 = int_to_ptr.vmem [resolvable:$false] %s1759_s16 }
  0x40   : > { %278 = vadd.xlane.f32.xlu1 %v277_v16  ;;  %v599_v52 = vrot.slane %v296_v32, %v598_v49  ;;  %v641_v54 = vrot.slane %v297_v41, %v584_v46  ;;  %v655_v55 = vrot.slane %v297_v41, %v598_v49  ;;  %v627_v56 = vrot.slane %v297_v41, %v570_v43  ;;  %p1757_p13 = pnand %p1756_p11, %p2456_p12  ;;  %s1761_s8 = scalar_lea.vmem %s1760_s16, 4096 }
  0x41   : > { %275 = vadd.xlane.f32.xlu0 %v274_v17  ;;  %v407_v43 = vand.u32 127, %v300_v24  ;;  %p1762_p5 = scmp.lt.s32.totalorder %s2395_s25, %s1760_s16  ;;  %p1763_p7 = scmp.lt.s32.totalorder %s1761_s8, %s1755_s14 }
  0x42   : > { %p1758_p4 = pneg %p1757_p13 }
  0x43   : > { %p1764_p8 = por %p1763_p7, %p1762_p5 }
  0x44   : > { %284 = vadd.xlane.f32.xlu1 %v283_v22 }
  0x45   : > { %281 = vadd.xlane.f32.xlu0 %v280_v23  ;;  %p1765_p10 = pnand %p1764_p8, %p1758_p4 }
  0x55   : > { %309 = vbcast.lane.b32.xlu1 %v303_v28, 264 }
  0x59   : > { %316 = vbcast.lane.b32.xlu1 %v314_v31, 256 }
  0x5b   : > { %305 = vbcast.lane.b32.xlu0 %v303_v28, 256 }
  0x5d   : > { %320 = vbcast.lane.b32.xlu1 %v314_v31, 264 }
  0x5f   : > { %552 = vbcast.lane.b32.xlu0 %v550_v33, 256 }
  0x61   : > { %510 = vbcast.lane.b32.xlu1 %v1586_v35, 256 }
  0x63   : > { %580 = vbcast.lane.b32.xlu0 %v578_v36, 256 }
  0x65   : > { %559 = vbcast.lane.b32.xlu1 %v557_v38, 256 }
  0x67   : > { %594 = vbcast.lane.b32.xlu0 %v592_v40, 256 }
  0x69   : > { %566 = vbcast.lane.b32.xlu1 %v564_v42, 256 }
  0x6b   : > { %608 = vbcast.lane.b32.xlu0 %v606_v44, 256 }
  0x6d   : > { %573 = vbcast.lane.b32.xlu1 %v571_v45, 256  ;;  %v412_v45 = vadd.s32 4294967288, %v407_v43 }
  0x6f   : > { %622 = vbcast.lane.b32.xlu0 %v620_v47, 256  ;;  %v415_v49 = vsub.s32 %v412_v45, %v1984_v25 }
  0x71   : > { %587 = vbcast.lane.b32.xlu1 %v585_v48, 256  ;;  %v2036_v48 = vsub.s32 %v407_v43, %v1984_v25 }
  0x73   : > { %636 = vbcast.lane.b32.xlu0 %v634_v50, 256 }
  0x75   : > { %601 = vbcast.lane.b32.xlu1 %v599_v52, 256 }
  0x79   : > { %615 = vbcast.lane.b32.xlu1 %v613_v53, 256 }
  0x7d   : > { %629 = vbcast.lane.b32.xlu1 %v627_v56, 256 }
  0xc1   : > { %v270_v57 = vpop.xlane.xlu1 %269 }
  0xc2   : > { %v264_v58 = vpop.xlane.xlu0 %263  ;;  %v288_v9 = vmul.f32 0.00390625, %v270_v57 }
  0xc3   : > { %v286_v2 = vmul.f32 0.00390625, %v264_v58 }
  0xc5   : > { %v273_v59 = vpop.xlane.xlu1 %272 }
  0xc6   : > { %v267_v60 = vpop.xlane.xlu0 %266  ;;  %v289_v13 = vmul.f32 0.00390625, %v273_v59 }
  0xc7   : > { %v287_v1 = vmul.f32 0.00390625, %v267_v60 }
  0xc9   : > { %v279_v61 = vpop.xlane.xlu1 %278 }
  0xca   : > { %v276_v62 = vpop.xlane.xlu0 %275  ;;  %v291_v19 = vmul.f32 0.00390625, %v279_v61 }
  0xcb   : > { %v290_v16 = vmul.f32 0.00390625, %v276_v62 }
  0xcd   : > { %v285_v63 = vpop.xlane.xlu1 %284 }
  0xce   : > { %v282_v0 = vpop.xlane.xlu0 %281  ;;  %v293_v27 = vmul.f32 0.00390625, %v285_v63 }
  0xcf   : > { %v292_v20 = vmul.f32 0.00390625, %v282_v0 }
  0xd1   : > { %v310_v3 = vpop.permute.xlu1 %309 }
  0xd2   : > { %v306_v4 = vpop.permute.xlu0 %305  ;;  %v327_v5 = vmul.f32 %v310_v3, %v287_v1  ;;  %v331_v15 = vmul.f32 %v310_v3, %v289_v13  ;;  %v335_v22 = vmul.f32 %v310_v3, %v291_v19  ;;  %v339_v29 = vmul.f32 %v310_v3, %v293_v27 }
  0xd3   : > { %v326_v6 = vmul.f32 %v306_v4, %v286_v2  ;;  %v330_v11 = vmul.f32 %v306_v4, %v288_v9  ;;  %v334_v17 = vmul.f32 %v306_v4, %v290_v16  ;;  %v338_v23 = vmul.f32 %v306_v4, %v292_v20 }
  0xd4   : > { %362 = vperm.xlu1 %1662, %v327_v5  }
  0xd5   : > { %359 = vperm.xlu0 %1661, %v326_v6   ;;  %v317_v7 = vpop.permute.xlu1 %316 }
  0xd6   : > { %v328_v8 = vmul.f32 %v317_v7, %v286_v2  ;;  %v332_v14 = vmul.f32 %v317_v7, %v288_v9  ;;  %v336_v21 = vmul.f32 %v317_v7, %v290_v16  ;;  %v340_v28 = vmul.f32 %v317_v7, %v292_v20  ;;  %v2012_v34 = vpop.permute.xlu0 %552 }
  0xd8   : > { %365 = vperm.xlu1 %1662, %v328_v8  }
  0xd9   : > { %v321_v10 = vpop.permute.xlu1 %320 }
  0xda   : > { %v329_v12 = vmul.f32 %v321_v10, %v287_v1  ;;  %v333_v18 = vmul.f32 %v321_v10, %v289_v13  ;;  %v337_v26 = vmul.f32 %v321_v10, %v291_v19  ;;  %v341_v30 = vmul.f32 %v321_v10, %v293_v27  ;;  %v2016_v36 = vpop.permute.xlu0 %580 }
  0xdc   : > { %371 = vperm.xlu1 %1662, %v330_v11   ;;  %368 = vperm.xlu0 %1661, %v329_v12  }
  0xdd   : > { %v2006_v31 = vpop.permute.xlu1 %510 }
  0xde   : > { %v2020_v38 = vpop.permute.xlu0 %594 }
  0xe0   : > { %377 = vperm.xlu1 %1662, %v332_v14   ;;  %374 = vperm.xlu0 %1661, %v331_v15  }
  0xe1   : > { %v2008_v32 = vpop.permute.xlu1 %559 }
  0xe2   : > { %v2024_v40 = vpop.permute.xlu0 %608 }
  0xe4   : > { %383 = vperm.xlu1 %1662, %v334_v17   ;;  %380 = vperm.xlu0 %1661, %v333_v18  }
  0xe5   : > { %v2010_v33 = vpop.permute.xlu1 %566 }
  0xe6   : > { %v2028_v42 = vpop.permute.xlu0 %622 }
  0xe8   : > { %389 = vperm.xlu1 %1662, %v336_v21   ;;  %386 = vperm.xlu0 %1661, %v335_v22  }
  0xe9   : > { %v2014_v35 = vpop.permute.xlu1 %573 }
  0xea   : > { %v2033_v46 = vpop.permute.xlu0 %636 }
  0xec   : > { %395 = vperm.xlu1 %1662, %v338_v23   ;;  %392 = vperm.xlu0 %1661, %v337_v26  }
  0xed   : > { %v2018_v37 = vpop.permute.xlu1 %587 }
  0xf0   : > { %401 = vperm.xlu1 %1662, %v340_v28   ;;  %398 = vperm.xlu0 %1661, %v339_v29  }
  0xf1   : > { %v2022_v39 = vpop.permute.xlu1 %601 }
  0xf4   : > { %650 = vbcast.lane.b32.xlu0 %v648_v51, 256  ;;  %643 = vbcast.lane.b32.xlu1 %v641_v54, 256 }
  0xf5   : > { %v2026_v41 = vpop.permute.xlu1 %615 }
  0xf8   : > { %404 = vperm.xlu0 %1661, %v341_v30   ;;  %657 = vbcast.lane.b32.xlu1 %v655_v55, 256 }
  0xf9   : > { %v2031_v44 = vpop.permute.xlu1 %629 }
 0x14f   : > { %v363_v47 = vpop.permute.xlu1 %362 }
 0x150   : > { %v360_v50 = vpop.permute.xlu0 %359  ;;  %v416_v52 = vrot.slane %v363_v47, %v415_v49 }
 0x151   : > { %v411_v53 = vrot.slane %v360_v50, %v2036_v48 }
 0x153   : > { %v366_v51 = vpop.permute.xlu1 %365  ;;  %v418_v57 = vsel %vm417_vm0, %v416_v52, %v411_v53 }
 0x154   : > { %v422_v24 = vrot.slane %v366_v51, %v2036_v48 }
 0x157   : > { %v372_v54 = vpop.permute.xlu1 %371  ;;  %v369_v55 = vpop.permute.xlu0 %368 }
 0x158   : > { %v426_v56 = vrot.slane %v369_v55, %v415_v49  ;;  %v431_v1 = vrot.slane %v372_v54, %v2036_v48 }
 0x15a   : > { %v427_v58 = vsel %vm417_vm0, %v426_v56, %v422_v24 }
 0x15b   : > { %v378_v59 = vpop.permute.xlu1 %377  ;;  %v375_v60 = vpop.permute.xlu0 %374  ;;  %v483_v25 = vsel %vm482_vm1, %v427_v58, %v418_v57 }
 0x15c   : > { %v492_v61 = vsel %vm491_vm2, %v483_v25, 0.0  ;;  %v435_v62 = vrot.slane %v375_v60, %v415_v49  ;;  %v440_v2 = vrot.slane %v378_v59, %v2036_v48 }
 0x15d   : > { %493 = vadd.xlane.f32.xlu1 %v492_v61 }
 0x15e   : > { %v436_v4 = vsel %vm417_vm0, %v435_v62, %v431_v1 }
 0x15f   : > { %v384_v63 = vpop.permute.xlu1 %383  ;;  %v381_v0 = vpop.permute.xlu0 %380 }
 0x160   : > { %v444_v3 = vrot.slane %v381_v0, %v415_v49  ;;  %v449_v12 = vrot.slane %v384_v63, %v2036_v48 }
 0x162   : > { %v445_v5 = vsel %vm417_vm0, %v444_v3, %v440_v2 }
 0x163   : > { %v387_v6 = vpop.permute.xlu0 %386  ;;  %v484_v7 = vsel %vm482_vm1, %v445_v5, %v436_v4  ;;  %v390_v9 = vpop.permute.xlu1 %389 }
 0x164   : > { %v495_v8 = vsel %vm491_vm2, %v484_v7, 0.0  ;;  %v453_v10 = vrot.slane %v387_v6, %v415_v49  ;;  %v458_v13 = vrot.slane %v390_v9, %v2036_v48 }
 0x165   : > { %496 = vadd.xlane.f32.xlu0 %v495_v8 }
 0x166   : > { %v454_v15 = vsel %vm417_vm0, %v453_v10, %v449_v12 }
 0x167   : > { %v393_v11 = vpop.permute.xlu0 %392  ;;  %v396_v17 = vpop.permute.xlu1 %395 }
 0x168   : > { %v462_v14 = vrot.slane %v393_v11, %v415_v49  ;;  %v467_v27 = vrot.slane %v396_v17, %v2036_v48 }
 0x16a   : > { %v463_v16 = vsel %vm417_vm0, %v462_v14, %v458_v13 }
 0x16b   : > { %v399_v18 = vpop.permute.xlu0 %398  ;;  %v485_v19 = vsel %vm482_vm1, %v463_v16, %v454_v15  ;;  %v402_v22 = vpop.permute.xlu1 %401 }
 0x16c   : > { %v498_v20 = vsel %vm491_vm2, %v485_v19, 0.0  ;;  %v471_v23 = vrot.slane %v399_v18, %v415_v49  ;;  %v476_v28 = vrot.slane %v402_v22, %v2036_v48 }
 0x16d   : > { %499 = vadd.xlane.f32.xlu0 %v498_v20 }
 0x16e   : > { %v472_v30 = vsel %vm417_vm0, %v471_v23, %v467_v27 }
 0x16f   : > { %v2057_v21 = vpop.permute.xlu0 %650  ;;  %v2065_v50 = vpop.permute.xlu1 %643 }
 0x173   : > { %v405_v26 = vpop.permute.xlu0 %404  ;;  %v2067_v51 = vpop.permute.xlu1 %657 }
 0x174   : > { %v480_v29 = vrot.slane %v405_v26, %v415_v49 }
 0x176   : > { %v481_v43 = vsel %vm417_vm0, %v480_v29, %v476_v28 }
 0x177   : > { %v486_v45 = vsel %vm482_vm1, %v481_v43, %v472_v30 }
 0x178   : > { %v501_v47 = vsel %vm491_vm2, %v486_v45, 0.0 }
 0x179   : > { %502 = vadd.xlane.f32.xlu0 %v501_v47 }
 0x1e6   : > { %v494_v52 = vpop.xlane.xlu1 %493 }
 0x1e7   : > { %v513_v53 = vadd.f32 %v2006_v31, %v494_v52 }
 0x1e9   : > { %v1587_v54 = vmul.f32 -1.442695, %v513_v53 }
 0x1eb   : > { %1663 = vpow2.f32 %v1587_v54 }
 0x1ee   : > { %v497_v49 = vpop.xlane.xlu0 %496 }
 0x1ef   : > { %v514_v56 = vadd.f32 %v2006_v31, %v497_v49 }
 0x1f1   : > { %v1588_v57 = vmul.f32 -1.442695, %v514_v56 }
 0x1f6   : > { %v500_v58 = vpop.xlane.xlu0 %499 }
 0x1f7   : > { %v2072_v25 = vadd.f32 %v2006_v31, %v500_v58 }
 0x1f8   : > { %v1664_v55 = vpop.eup %1663 }
 0x1f9   : > { %v529_v24 = vadd.f32 1.0, %v1664_v55  ;;  %v1589_v63 = vmul.f32 -1.442695, %v2072_v25 }
 0x1fb   : > { %1665 = vrcp.f32 %v529_v24 }
 0x1fc   : > { %1667 = vpow2.f32 %v1588_v57 }
 0x1fd   : > { %1669 = vpow2.f32 %v1589_v63 }
 0x202   : > { %v503_v3 = vpop.xlane.xlu0 %502 }
 0x203   : > { %v516_v5 = vadd.f32 %v2006_v31, %v503_v3 }
 0x205   : > { %v1590_v8 = vmul.f32 -1.442695, %v516_v5 }
 0x208   : > { %v1666_v59 = vpop.eup %1665 }
 0x209   : > { %v541_v60 = vmul.f32 %v1666_v59, %v513_v53  ;;  %v1668_v2 = vpop.eup %1667 }
 0x20a   : > { %v530_v4 = vadd.f32 1.0, %v1668_v2  ;;  %v1670_v31 = vpop.eup %1669 }
 0x20b   : > { %v676_v61 = vmul.f32 %v2008_v32, %v541_v60  ;;  %v675_v62 = vmul.f32 %v2012_v34, %v541_v60  ;;  %v678_v0 = vmul.f32 %v2014_v35, %v541_v60  ;;  %v677_v1 = vmul.f32 %v2010_v33, %v541_v60 }
 0x20c   : > { %v680_v6 = vmul.f32 %v2018_v37, %v541_v60  ;;  %v679_v7 = vmul.f32 %v2016_v36, %v541_v60  ;;  %1671 = vrcp.f32 %v530_v4  ;;  %v682_v9 = vmul.f32 %v2022_v39, %v541_v60 }
 0x20d   : > { %807 = vperm.xlu1 %1662, %v676_v61   ;;  %804 = vperm.xlu0 %1661, %v675_v62   ;;  %v681_v10 = vmul.f32 %v2020_v38, %v541_v60  ;;  %1673 = vpow2.f32 %v1590_v8  ;;  %v684_v11 = vmul.f32 %v2026_v41, %v541_v60  ;;  %v683_v12 = vmul.f32 %v2024_v40, %v541_v60 }
 0x20e   : > { %v686_v13 = vmul.f32 %v2031_v44, %v541_v60  ;;  %v685_v14 = vmul.f32 %v2028_v42, %v541_v60  ;;  %v531_v15 = vadd.f32 1.0, %v1670_v31  ;;  %v688_v16 = vmul.f32 %v2065_v50, %v541_v60 }
 0x20f   : > { %v687_v17 = vmul.f32 %v2033_v46, %v541_v60  ;;  %v690_v20 = vmul.f32 %v2067_v51, %v541_v60  ;;  %v689_v22 = vmul.f32 %v2057_v21, %v541_v60 }
 0x210   : > { %1675 = vrcp.f32 %v531_v15 }
 0x211   : > { %813 = vperm.xlu1 %1662, %v678_v0   ;;  %810 = vperm.xlu0 %1661, %v677_v1  }
 0x215   : > { %819 = vperm.xlu1 %1662, %v680_v6   ;;  %816 = vperm.xlu0 %1661, %v679_v7  }
 0x219   : > { %825 = vperm.xlu1 %1662, %v682_v9   ;;  %822 = vperm.xlu0 %1661, %v681_v10   ;;  %v1672_v18 = vpop.eup %1671 }
 0x21a   : > { %v2090_v19 = vmul.f32 %v1672_v18, %v514_v56  ;;  %v1674_v23 = vpop.eup %1673 }
 0x21b   : > { %v532_v26 = vadd.f32 1.0, %v1674_v23 }
 0x21c   : > { %v692_v27 = vmul.f32 %v2008_v32, %v2090_v19  ;;  %v691_v28 = vmul.f32 %v2012_v34, %v2090_v19  ;;  %v694_v29 = vmul.f32 %v2014_v35, %v2090_v19  ;;  %v693_v30 = vmul.f32 %v2010_v33, %v2090_v19 }
 0x21d   : > { %831 = vperm.xlu1 %1662, %v684_v11   ;;  %828 = vperm.xlu0 %1661, %v683_v12   ;;  %1677 = vrcp.f32 %v532_v26  ;;  %v696_v43 = vmul.f32 %v2018_v37, %v2090_v19  ;;  %v695_v45 = vmul.f32 %v2016_v36, %v2090_v19  ;;  %v1676_v47 = vpop.eup %1675  ;;  %v700_v53 = vmul.f32 %v2026_v41, %v2090_v19 }
 0x21e   : > { %v2107_v52 = vmul.f32 %v1676_v47, %v2072_v25  ;;  %v699_v54 = vmul.f32 %v2024_v40, %v2090_v19  ;;  %v701_v63 = vmul.f32 %v2028_v42, %v2090_v19  ;;  %v703_v3 = vmul.f32 %v2033_v46, %v2090_v19 }
 0x21f   : > { %v697_v9 = vmul.f32 %v2020_v38, %v2090_v19  ;;  %v706_v12 = vmul.f32 %v2067_v51, %v2090_v19  ;;  %v698_v31 = vmul.f32 %v2022_v39, %v2090_v19 }
 0x220   : > { %v708_v55 = vmul.f32 %v2008_v32, %v2107_v52  ;;  %v707_v49 = vmul.f32 %v2012_v34, %v2107_v52  ;;  %v716_v57 = vmul.f32 %v2026_v41, %v2107_v52  ;;  %v715_v58 = vmul.f32 %v2024_v40, %v2107_v52 }
 0x221   : > { %837 = vperm.xlu1 %1662, %v686_v13   ;;  %834 = vperm.xlu0 %1661, %v685_v14   ;;  %v709_v62 = vmul.f32 %v2010_v33, %v2107_v52  ;;  %v718_v0 = vmul.f32 %v2031_v44, %v2107_v52  ;;  %v710_v1 = vmul.f32 %v2014_v35, %v2107_v52 }
 0x222   : > { %v720_v6 = vmul.f32 %v2065_v50, %v2107_v52  ;;  %v712_v7 = vmul.f32 %v2018_v37, %v2107_v52  ;;  %v721_v10 = vmul.f32 %v2057_v21, %v2107_v52  ;;  %v713_v11 = vmul.f32 %v2020_v38, %v2107_v52 }
 0x223   : > { %v722_v13 = vmul.f32 %v2067_v51, %v2107_v52  ;;  %v714_v14 = vmul.f32 %v2022_v39, %v2107_v52 }
 0x225   : > { %843 = vperm.xlu1 %1662, %v688_v16   ;;  %840 = vperm.xlu0 %1661, %v687_v17  }
 0x229   : > { %849 = vperm.xlu1 %1662, %v690_v20   ;;  %846 = vperm.xlu0 %1661, %v689_v22  }
 0x22a   : > { %v1678_v24 = vpop.eup %1677 }
 0x22b   : > { %v2117_v56 = vmul.f32 %v1678_v24, %v516_v5  ;;  %v719_v5 = vmul.f32 %v2033_v46, %v2107_v52 }
 0x22d   : > { %855 = vperm.xlu1 %1662, %v692_v27   ;;  %852 = vperm.xlu0 %1661, %v691_v28   ;;  %v724_v59 = vmul.f32 %v2008_v32, %v2117_v56  ;;  %v723_v60 = vmul.f32 %v2012_v34, %v2117_v56  ;;  %v732_v25 = vmul.f32 %v2026_v41, %v2117_v56 }
 0x22e   : > { %v731_v61 = vmul.f32 %v2024_v40, %v2117_v56  ;;  %v725_v32 = vmul.f32 %v2010_v33, %v2117_v56  ;;  %v717_v34 = vmul.f32 %v2028_v42, %v2107_v52  ;;  %v702_v40 = vmul.f32 %v2031_v44, %v2090_v19 }
 0x22f   : > { %v733_v41 = vmul.f32 %v2028_v42, %v2117_v56  ;;  %v734_v33 = vmul.f32 %v2031_v44, %v2117_v56  ;;  %v726_v2 = vmul.f32 %v2014_v35, %v2117_v56  ;;  %v711_v42 = vmul.f32 %v2016_v36, %v2107_v52 }
 0x230   : > { %v727_v4 = vmul.f32 %v2016_v36, %v2117_v56  ;;  %v704_v35 = vmul.f32 %v2065_v50, %v2090_v19  ;;  %v735_v44 = vmul.f32 %v2033_v46, %v2117_v56  ;;  %v736_v36 = vmul.f32 %v2065_v50, %v2117_v56 }
 0x231   : > { %861 = vperm.xlu1 %1662, %v694_v29   ;;  %858 = vperm.xlu0 %1661, %v693_v30   ;;  %v728_v8 = vmul.f32 %v2018_v37, %v2117_v56  ;;  %v705_v46 = vmul.f32 %v2057_v21, %v2090_v19  ;;  %v737_v37 = vmul.f32 %v2057_v21, %v2117_v56 }
 0x232   : > { %v729_v50 = vmul.f32 %v2020_v38, %v2117_v56  ;;  %v738_v38 = vmul.f32 %v2067_v51, %v2117_v56  ;;  %v730_v21 = vmul.f32 %v2022_v39, %v2117_v56 }
 0x235   : > { %867 = vperm.xlu1 %1662, %v696_v43   ;;  %864 = vperm.xlu0 %1661, %v695_v45  }
 0x239   : > { %879 = vperm.xlu1 %1662, %v700_v53   ;;  %876 = vperm.xlu0 %1661, %v699_v54  }
 0x23d   : > { %903 = vperm.xlu1 %1662, %v708_v55   ;;  %900 = vperm.xlu0 %1661, %v707_v49  }
 0x241   : > { %927 = vperm.xlu1 %1662, %v716_v57   ;;  %924 = vperm.xlu0 %1661, %v715_v58  }
 0x245   : > { %951 = vperm.xlu1 %1662, %v724_v59   ;;  %948 = vperm.xlu0 %1661, %v723_v60  }
 0x249   : > { %975 = vperm.xlu1 %1662, %v732_v25   ;;  %972 = vperm.xlu0 %1661, %v731_v61  }
 0x24d   : > { %906 = vperm.xlu1 %1662, %v709_v62   ;;  %882 = vperm.xlu0 %1661, %v701_v63  }
 0x251   : > { %954 = vperm.xlu1 %1662, %v725_v32   ;;  %930 = vperm.xlu0 %1661, %v717_v34  }
 0x255   : > { %885 = vperm.xlu1 %1662, %v702_v40   ;;  %978 = vperm.xlu0 %1661, %v733_v41  }
 0x259   : > { %933 = vperm.xlu1 %1662, %v718_v0   ;;  %909 = vperm.xlu0 %1661, %v710_v1  }
 0x25d   : > { %981 = vperm.xlu1 %1662, %v734_v33   ;;  %957 = vperm.xlu0 %1661, %v726_v2  }
 0x261   : > { %912 = vperm.xlu1 %1662, %v711_v42   ;;  %888 = vperm.xlu0 %1661, %v703_v3  }
 0x265   : > { %960 = vperm.xlu1 %1662, %v727_v4   ;;  %936 = vperm.xlu0 %1661, %v719_v5  }
 0x269   : > { %891 = vperm.xlu1 %1662, %v704_v35   ;;  %984 = vperm.xlu0 %1661, %v735_v44  }
 0x26d   : > { %939 = vperm.xlu1 %1662, %v720_v6   ;;  %915 = vperm.xlu0 %1661, %v712_v7  }
 0x271   : > { %987 = vperm.xlu1 %1662, %v736_v36   ;;  %963 = vperm.xlu0 %1661, %v728_v8  }
 0x275   : > { %894 = vperm.xlu1 %1662, %v705_v46   ;;  %870 = vperm.xlu0 %1661, %v697_v9  }
 0x279   : > { %942 = vperm.xlu1 %1662, %v721_v10   ;;  %918 = vperm.xlu0 %1661, %v713_v11  }
 0x27d   : > { %990 = vperm.xlu1 %1662, %v737_v37   ;;  %966 = vperm.xlu0 %1661, %v729_v50  }
 0x281   : > { %897 = vperm.xlu1 %1662, %v706_v12   ;;  %873 = vperm.xlu0 %1661, %v698_v31  }
 0x285   : > { %945 = vperm.xlu1 %1662, %v722_v13   ;;  %921 = vperm.xlu0 %1661, %v714_v14  }
 0x288   : > { %v808_v15 = vpop.permute.xlu1 %807  ;;  %v805_v16 = vpop.permute.xlu0 %804 }
 0x289   : > { %993 = vperm.xlu1 %1662, %v738_v38   ;;  %969 = vperm.xlu0 %1661, %v730_v21   ;;  %v1002_v22 = vrot.slane %v808_v15, %v2036_v48  ;;  %v998_v23 = vrot.slane %v805_v16, %v2036_v48 }
 0x28b   : > { %v1251_v51 = vsel %vm482_vm1, %v1002_v22, %v998_v23 }
 0x28c   : > { %v814_v17 = vpop.permute.xlu1 %813  ;;  %v811_v18 = vpop.permute.xlu0 %810 }
 0x28d   : > { %v1006_v28 = vrot.slane %v811_v18, %v2036_v48  ;;  %v1010_v39 = vrot.slane %v814_v17, %v2036_v48 }
 0x28f   : > { %v1253_v43 = vsel %vm1252_vm3, %v1006_v28, %v1251_v51 }
 0x290   : > { %v820_v19 = vpop.permute.xlu1 %819  ;;  %v817_v20 = vpop.permute.xlu0 %816  ;;  %v1255_v54 = vsel %vm1254_vm4, %v1010_v39, %v1253_v43 }
 0x291   : > { %v1014_v45 = vrot.slane %v817_v20, %v2036_v48  ;;  %v1018_v53 = vrot.slane %v820_v19, %v2036_v48 }
 0x293   : > { %v1257_v24 = vsel %vm1256_vm5, %v1014_v45, %v1255_v54 }
 0x294   : > { %v826_v26 = vpop.permute.xlu1 %825  ;;  %v823_v27 = vpop.permute.xlu0 %822  ;;  %v1259_v63 = vsel %vm1258_vm6, %v1018_v53, %v1257_v24 }
 0x295   : > { %v1022_v56 = vrot.slane %v823_v27, %v2036_v48  ;;  %v1026_v25 = vrot.slane %v826_v26, %v2036_v48 }
 0x297   : > { %v1261_v34 = vsel %vm1260_vm7, %v1022_v56, %v1259_v63 }
 0x298   : > { %v832_v29 = vpop.permute.xlu1 %831  ;;  %v829_v30 = vpop.permute.xlu0 %828  ;;  %v1263_v2 = vsel %vm1262_vm8, %v1026_v25, %v1261_v34 }
 0x299   : > { %v1034_v47 = vrot.slane %v832_v29, %v2036_v48  ;;  %v1030_v52 = vrot.slane %v829_v30, %v2036_v48  ;;  %v1322_v5 = vsel %vm1321_vm9, %v1263_v2, 0.0 }
 0x29b   : > { %v1264_v58 = vsel %vm482_vm1, %v1034_v47, %v1030_v52 }
 0x29c   : > { %v838_v55 = vpop.permute.xlu1 %837  ;;  %v835_v49 = vpop.permute.xlu0 %834 }
 0x29d   : > { %v1038_v57 = vrot.slane %v835_v49, %v2036_v48  ;;  %v1042_v59 = vrot.slane %v838_v55, %v2036_v48 }
 0x29f   : > { %v1265_v60 = vsel %vm1252_vm3, %v1038_v57, %v1264_v58 }
 0x2a0   : > { %v844_v61 = vpop.permute.xlu1 %843  ;;  %v841_v62 = vpop.permute.xlu0 %840  ;;  %v1266_v41 = vsel %vm1254_vm4, %v1042_v59, %v1265_v60 }
 0x2a1   : > { %v1046_v32 = vrot.slane %v841_v62, %v2036_v48  ;;  %v1050_v40 = vrot.slane %v844_v61, %v2036_v48 }
 0x2a3   : > { %v1267_v0 = vsel %vm1256_vm5, %v1046_v32, %v1266_v41 }
 0x2a4   : > { %v850_v1 = vpop.permute.xlu1 %849  ;;  %v847_v33 = vpop.permute.xlu0 %846  ;;  %v1268_v4 = vsel %vm1258_vm6, %v1050_v40, %v1267_v0 }
 0x2a5   : > { %v1058_v42 = vrot.slane %v850_v1, %v2036_v48  ;;  %v1054_v3 = vrot.slane %v847_v33, %v2036_v48 }
 0x2a7   : > { %v1269_v35 = vsel %vm1260_vm7, %v1054_v3, %v1268_v4 }
 0x2a8   : > { %v856_v44 = vpop.permute.xlu1 %855  ;;  %1323 = vadd.xlane.f32.xlu0 %v1322_v5  ;;  %v853_v6 = vpop.permute.xlu0 %852  ;;  %v1270_v8 = vsel %vm1262_vm8, %v1058_v42, %v1269_v35 }
 0x2a9   : > { %v1066_v7 = vrot.slane %v856_v44, %v2036_v48  ;;  %v1062_v36 = vrot.slane %v853_v6, %v2036_v48  ;;  %v1325_v11 = vsel %vm1321_vm9, %v1270_v8, 0.0 }
 0x2ab   : > { %v1271_v46 = vsel %vm482_vm1, %v1066_v7, %v1062_v36 }
 0x2ac   : > { %v862_v9 = vpop.permute.xlu1 %861  ;;  %v859_v10 = vpop.permute.xlu0 %858 }
 0x2ad   : > { %v1074_v37 = vrot.slane %v862_v9, %v2036_v48  ;;  %v1070_v50 = vrot.slane %v859_v10, %v2036_v48  ;;  %1326 = vadd.xlane.f32.xlu1 %v1325_v11 }
 0x2af   : > { %v1272_v12 = vsel %vm1252_vm3, %v1070_v50, %v1271_v46 }
 0x2b0   : > { %v868_v31 = vpop.permute.xlu1 %867  ;;  %v1273_v13 = vsel %vm1254_vm4, %v1074_v37, %v1272_v12  ;;  %v865_v14 = vpop.permute.xlu0 %864 }
 0x2b1   : > { %v1082_v38 = vrot.slane %v868_v31, %v2036_v48  ;;  %v1078_v21 = vrot.slane %v865_v14, %v2036_v48 }
 0x2b3   : > { %v1274_v15 = vsel %vm1256_vm5, %v1078_v21, %v1273_v13 }
 0x2b4   : > { %v880_v16 = vpop.permute.xlu1 %879  ;;  %v877_v17 = vpop.permute.xlu0 %876  ;;  %v2238_v18 = vsel %vm1258_vm6, %v1082_v38, %v1274_v15 }
 0x2b5   : > { %v1098_v19 = vrot.slane %v880_v16, %v2036_v48  ;;  %v1094_v20 = vrot.slane %v877_v17, %v2036_v48 }
 0x2b7   : > { %v1278_v22 = vsel %vm482_vm1, %v1098_v19, %v1094_v20 }
 0x2b8   : > { %v904_v23 = vpop.permute.xlu1 %903  ;;  %v901_v26 = vpop.permute.xlu0 %900 }
 0x2b9   : > { %v1130_v27 = vrot.slane %v904_v23, %v2036_v48  ;;  %v1126_v28 = vrot.slane %v901_v26, %v2036_v48 }
 0x2bb   : > { %v1285_v51 = vsel %vm482_vm1, %v1130_v27, %v1126_v28 }
 0x2bc   : > { %v928_v39 = vpop.permute.xlu1 %927  ;;  %v925_v29 = vpop.permute.xlu0 %924 }
 0x2bd   : > { %v1162_v4 = vrot.slane %v928_v39, %v2036_v48  ;;  %v1158_v5 = vrot.slane %v925_v29, %v2036_v48 }
 0x2bf   : > { %v1292_v12 = vsel %vm482_vm1, %v1162_v4, %v1158_v5 }
 0x2c0   : > { %v952_v30 = vpop.permute.xlu1 %951  ;;  %v949_v43 = vpop.permute.xlu0 %948 }
 0x2c1   : > { %v1194_v45 = vrot.slane %v952_v30, %v2036_v48  ;;  %v1190_v47 = vrot.slane %v949_v43, %v2036_v48 }
 0x2c3   : > { %v1299_v52 = vsel %vm482_vm1, %v1194_v45, %v1190_v47 }
 0x2c4   : > { %v976_v53 = vpop.permute.xlu1 %975  ;;  %v973_v54 = vpop.permute.xlu0 %972 }
 0x2c5   : > { %v1226_v35 = vrot.slane %v976_v53, %v2036_v48  ;;  %v1222_v44 = vrot.slane %v973_v54, %v2036_v48 }
 0x2c7   : > { %v1306_v31 = vsel %vm482_vm1, %v1226_v35, %v1222_v44 }
 0x2c8   : > { %v907_v55 = vpop.permute.xlu1 %906  ;;  %v883_v49 = vpop.permute.xlu0 %882 }
 0x2c9   : > { %v1134_v36 = vrot.slane %v907_v55, %v2036_v48  ;;  %v1102_v8 = vrot.slane %v883_v49, %v2036_v48 }
 0x2cb   : > { %v1286_v15 = vsel %vm1252_vm3, %v1134_v36, %v1285_v51  ;;  %v1279_v16 = vsel %vm1252_vm3, %v1102_v8, %v1278_v22 }
 0x2cc   : > { %v955_v24 = vpop.permute.xlu1 %954  ;;  %v931_v56 = vpop.permute.xlu0 %930 }
 0x2cd   : > { %v1198_v46 = vrot.slane %v955_v24, %v2036_v48  ;;  %v1166_v9 = vrot.slane %v931_v56, %v2036_v48 }
 0x2cf   : > { %v1300_v17 = vsel %vm1252_vm3, %v1198_v46, %v1299_v52  ;;  %v1293_v20 = vsel %vm1252_vm3, %v1166_v9, %v1292_v12 }
 0x2d0   : > { %v886_v57 = vpop.permute.xlu1 %885  ;;  %v979_v58 = vpop.permute.xlu0 %978 }
 0x2d1   : > { %v1106_v10 = vrot.slane %v886_v57, %v2036_v48  ;;  %v1230_v11 = vrot.slane %v979_v58, %v2036_v48 }
 0x2d3   : > { %v1280_v23 = vsel %vm1254_vm4, %v1106_v10, %v1279_v16  ;;  %v1307_v28 = vsel %vm1252_vm3, %v1230_v11, %v1306_v31 }
 0x2d4   : > { %v934_v59 = vpop.permute.xlu1 %933  ;;  %v910_v60 = vpop.permute.xlu0 %909 }
 0x2d5   : > { %v1170_v37 = vrot.slane %v934_v59, %v2036_v48  ;;  %v1138_v50 = vrot.slane %v910_v60, %v2036_v48 }
 0x2d7   : > { %v1294_v39 = vsel %vm1254_vm4, %v1170_v37, %v1293_v20  ;;  %v1287_v51 = vsel %vm1254_vm4, %v1138_v50, %v1286_v15 }
 0x2d8   : > { %v982_v25 = vpop.permute.xlu1 %981  ;;  %v958_v61 = vpop.permute.xlu0 %957 }
 0x2d9   : > { %v1234_v13 = vrot.slane %v982_v25, %v2036_v48  ;;  %v1202_v14 = vrot.slane %v958_v61, %v2036_v48 }
 0x2db   : > { %v1308_v29 = vsel %vm1254_vm4, %v1234_v13, %v1307_v28  ;;  %v1301_v30 = vsel %vm1254_vm4, %v1202_v14, %v1300_v17  ;;  %v1591_v17 = vld [vmem:[%s2446_s4] ss:$0 sm:$0xff] }
 0x2dc   : > { %v913_v62 = vpop.permute.xlu1 %912  ;;  %v889_v63 = vpop.permute.xlu0 %888 }
 0x2dd   : > { %v1142_v19 = vrot.slane %v913_v62, %v2036_v48  ;;  %v1110_v26 = vrot.slane %v889_v63, %v2036_v48 }
 0x2df   : > { %v1288_v53 = vsel %vm1256_vm5, %v1142_v19, %v1287_v51  ;;  %v1281_v24 = vsel %vm1256_vm5, %v1110_v26, %v1280_v23 }
 0x2e0   : > { %v2249_v32 = vpop.permute.xlu1 %960  ;;  %v937_v34 = vpop.permute.xlu0 %936 }
 0x2e1   : > { %v1174_v43 = vrot.slane %v937_v34, %v2036_v48 }
 0x2e3   : > { %v1295_v62 = vsel %vm1256_vm5, %v1174_v43, %v1294_v39 }
 0x2e4   : > { %v892_v40 = vpop.permute.xlu1 %891  ;;  %v2251_v41 = vpop.permute.xlu0 %984 }
 0x2e5   : > { %v1114_v22 = vrot.slane %v892_v40, %v2036_v48  ;;  %v1238_v56 = vrot.slane %v2251_v41, %v2036_v48 }
 0x2e7   : > { %v1282_v59 = vsel %vm1258_vm6, %v1114_v22, %v1281_v24  ;;  %v1309_v4 = vsel %vm1256_vm5, %v1238_v56, %v1308_v29 }
 0x2e8   : > { %v2253_v0 = vpop.permute.xlu1 %939  ;;  %v2255_v1 = vpop.permute.xlu0 %915 }
 0x2e9   : > { %v1178_v54 = vrot.slane %v2253_v0, %v2036_v48  ;;  %v1146_v60 = vrot.slane %v2255_v1, %v2036_v48 }
 0x2eb   : > { %v1296_v0 = vsel %vm1258_vm6, %v1178_v54, %v1295_v62  ;;  %v1289_v44 = vsel %vm1258_vm6, %v1146_v60, %v1288_v53 }
 0x2ec   : > { %v2257_v33 = vpop.permute.xlu1 %987  ;;  %v2259_v2 = vpop.permute.xlu0 %963 }
 0x2ed   : > { %v1242_v25 = vrot.slane %v2257_v33, %v2036_v48 }
 0x2f0   : > { %v895_v42 = vpop.permute.xlu1 %894  ;;  %v871_v3 = vpop.permute.xlu0 %870 }
 0x2f1   : > { %v1086_v27 = vrot.slane %v871_v3, %v2036_v48  ;;  %v1118_v45 = vrot.slane %v895_v42, %v2036_v48  ;;  %v1206_v3 = vrot.slane %v2249_v32, %v2036_v48 }
 0x2f3   : > { %v1276_v58 = vsel %vm1260_vm7, %v1086_v27, %v2238_v18  ;;  %v1283_v18 = vsel %vm1260_vm7, %v1118_v45, %v1282_v59  ;;  %v1302_v12 = vsel %vm1256_vm5, %v1206_v3, %v1301_v30 }
 0x2f4   : > { %v943_v6 = vpop.permute.xlu1 %942  ;;  %v2265_v7 = vpop.permute.xlu0 %918 }
 0x2f5   : > { %v1182_v57 = vrot.slane %v943_v6, %v2036_v48  ;;  %v1150_v63 = vrot.slane %v2265_v7, %v2036_v48  ;;  %v1310_v6 = vsel %vm1258_vm6, %v1242_v25, %v1309_v4  ;;  %v1210_v7 = vrot.slane %v2259_v2, %v2036_v48 }
 0x2f7   : > { %v1297_v35 = vsel %vm1260_vm7, %v1182_v57, %v1296_v0  ;;  %v1290_v11 = vsel %vm1260_vm7, %v1150_v63, %v1289_v44  ;;  %v1303_v13 = vsel %vm1258_vm6, %v1210_v7, %v1302_v12  ;;  %v1712_v12 = vld [vmem:[%s1961_s28 + $0x8] sm:$0xff] }
 0x2f8   : > { %v2279_v38 = vpop.permute.xlu1 %990  ;;  %v2281_v21 = vpop.permute.xlu0 %966 }
 0x2f9   : > { %v1246_v5 = vrot.slane %v2279_v38, %v2036_v48  ;;  %v1214_v8 = vrot.slane %v2281_v21, %v2036_v48 }
 0x2fb   : > { %v1311_v31 = vsel %vm1260_vm7, %v1246_v5, %v1310_v6  ;;  %v1304_v15 = vsel %vm1260_vm7, %v1214_v8, %v1303_v13  ;;  %v1713_v13 = vld [vmem:[%s1961_s28 + $0x20] sm:$0xff] }
 0x2fc   : > { %v898_v47 = vpop.permute.xlu1 %897  ;;  %v874_v52 = vpop.permute.xlu0 %873 }
 0x2fd   : > { %v1122_v55 = vrot.slane %v898_v47, %v2036_v48  ;;  %v1090_v49 = vrot.slane %v874_v52, %v2036_v48 }
 0x2ff   : > { %v1277_v61 = vsel %vm1262_vm8, %v1090_v49, %v1276_v58  ;;  %v1284_v33 = vsel %vm1262_vm8, %v1122_v55, %v1283_v18 }
 0x300   : > { %v946_v34 = vpop.permute.xlu1 %945  ;;  %v922_v40 = vpop.permute.xlu0 %921  ;;  %v1328_v41 = vsel %vm1321_vm9, %v1277_v61, 0.0  ;;  %v1331_v10 = vsel %vm1321_vm9, %v1284_v33, 0.0 }
 0x301   : > { %v1186_v1 = vrot.slane %v946_v34, %v2036_v48  ;;  %v1154_v42 = vrot.slane %v922_v40, %v2036_v48  ;;  %1329 = vadd.xlane.f32.xlu0 %v1328_v41 }
 0x303   : > { %v1298_v36 = vsel %vm1262_vm8, %v1186_v1, %v1297_v35  ;;  %v1291_v2 = vsel %vm1262_vm8, %v1154_v42, %v1290_v11 }
 0x304   : > { %v994_v32 = vpop.permute.xlu1 %993  ;;  %v970_v46 = vpop.permute.xlu0 %969  ;;  %v1337_v9 = vsel %vm1321_vm9, %v1298_v36, 0.0  ;;  %v1334_v21 = vsel %vm1321_vm9, %v1291_v2, 0.0 }
 0x305   : > { %v1250_v37 = vrot.slane %v994_v32, %v2036_v48  ;;  %v1218_v50 = vrot.slane %v970_v46, %v2036_v48  ;;  %1338 = vadd.xlane.f32.xlu1 %v1337_v9  ;;  %1332 = vadd.xlane.f32.xlu0 %v1331_v10 }
 0x307   : > { %v1312_v14 = vsel %vm1262_vm8, %v1250_v37, %v1311_v31  ;;  %v1305_v48 = vsel %vm1262_vm8, %v1218_v50, %v1304_v15  ;;  %v1711_v50 = vld [vmem:[%s1961_s28] sm:$0xff] }
 0x308   : > { %v1343_v38 = vsel %vm1321_vm9, %v1312_v14, 0.0  ;;  %v1340_v16 = vsel %vm1321_vm9, %v1305_v48, 0.0 }
 0x309   : > { %1344 = vadd.xlane.f32.xlu1 %v1343_v38  ;;  %1335 = vadd.xlane.f32.xlu0 %v1334_v21  ;;  %v1714_v38 = vld [vmem:[%s1961_s28 + $0x28] sm:$0xff] }
 0x30d   : > { %1341 = vadd.xlane.f32.xlu0 %v1340_v16  ;;  %v1715_v16 = vld [vmem:[%s1961_s28 + $0x10] sm:$0xff] }
 0x31a   : > { %1356 = vbcast.lane.b32.xlu1 %v1591_v17, 264 }
 0x323   : > { %1352 = vbcast.lane.b32.xlu0 %v1591_v17, 256 }
 0x331   : > { %v1324_v19 = vpop.xlane.xlu0 %1323 }
 0x336   : > { %v1327_v20 = vpop.xlane.xlu1 %1326 }
 0x38a   : > { %v1330_v23 = vpop.xlane.xlu0 %1329 }
 0x38e   : > { %v1339_v26 = vpop.xlane.xlu1 %1338  ;;  %v1333_v27 = vpop.xlane.xlu0 %1332 }
 0x392   : > { %v1345_v28 = vpop.xlane.xlu1 %1344  ;;  %v1336_v39 = vpop.xlane.xlu0 %1335 }
 0x396   : > { %v1357_v51 = vpop.permute.xlu1 %1356  ;;  %v1342_v22 = vpop.xlane.xlu0 %1341 }
 0x397   : > { %v1361_v29 = vadd.f32 %v1357_v51, %v1327_v20  ;;  %v1363_v45 = vadd.f32 %v1357_v51, %v1333_v27  ;;  %v1365_v56 = vadd.f32 %v1357_v51, %v1339_v26  ;;  %v1367_v59 = vadd.f32 %v1357_v51, %v1345_v28  ;;  %v1718_v27 = vld [vmem:[%s1961_s28 + $0x48] sm:$0xff] }
 0x399   : > { %v1593_v30 = vmul.f32 -1.442695, %v1361_v29  ;;  %v1595_v57 = vmul.f32 -1.442695, %v1363_v45  ;;  %v1597_v60 = vmul.f32 -1.442695, %v1365_v56 }
 0x39a   : > { %v1353_v43 = vpop.permute.xlu0 %1352  ;;  %v1599_v25 = vmul.f32 -1.442695, %v1367_v59  ;;  %v1721_v45 = vld [vmem:[%s1961_s28 + $0x60] sm:$0xff] }
 0x39b   : > { %v1360_v47 = vadd.f32 %v1353_v43, %v1324_v19  ;;  %v1362_v52 = vadd.f32 %v1353_v43, %v1330_v23  ;;  %v1364_v53 = vadd.f32 %v1353_v43, %v1336_v39  ;;  %v1366_v54 = vadd.f32 %v1353_v43, %v1342_v22  ;;  %v1716_v19 = vld [vmem:[%s1961_s28 + $0x18] sm:$0xff]  ;;  %v1717_v23 = vld [vmem:[%s1961_s28 + $0x40] sm:$0xff]  ;;  %v1719_v22 = vld [vmem:[%s1961_s28 + $0x30] sm:$0xff] }
 0x39c   : > { %1679 = vpow2.f32 %v1593_v30  ;;  %v1720_v30 = vld [vmem:[%s1961_s28 + $0x38] sm:$0xff] }
 0x39d   : > { %v1592_v55 = vmul.f32 -1.442695, %v1360_v47  ;;  %v1594_v49 = vmul.f32 -1.442695, %v1362_v52  ;;  %v1596_v24 = vmul.f32 -1.442695, %v1364_v53 }
 0x39e   : > { %v1598_v58 = vmul.f32 -1.442695, %v1366_v54  ;;  %v1722_v52 = vld [vmem:[%s1961_s28 + $0x68] sm:$0xff] }
 0x39f   : > { %1681 = vpow2.f32 %v1592_v55  ;;  %v1723_v55 = vld [vmem:[%s1961_s28 + $0x50] sm:$0xff] }
 0x3a0   : > { %1683 = vpow2.f32 %v1594_v49 }
 0x3a1   : > { %1685 = vpow2.f32 %v1596_v24  ;;  %v1724_v24 = vld [vmem:[%s1961_s28 + $0x58] sm:$0xff] }
 0x3a2   : > { %1687 = vpow2.f32 %v1595_v57 }
 0x3a3   : > { %1689 = vpow2.f32 %v1598_v58  ;;  %v1725_v58 = vld [vmem:[%s1961_s28 + $0x70] sm:$0xff] }
 0x3a4   : > { %1691 = vpow2.f32 %v1597_v60  ;;  %v1726_v60 = vld [vmem:[%s1961_s28 + $0x78] sm:$0xff] }
 0x3a5   : > { %1693 = vpow2.f32 %v1599_v25 }
 0x3a9   : > { %v1680_v61 = vpop.eup %1679 }
 0x3aa   : > { %v1393_v18 = vadd.f32 1.0, %v1680_v61 }
 0x3ac   : > { %v1682_v62 = vpop.eup %1681 }
 0x3ad   : > { %v1684_v63 = vpop.eup %1683  ;;  %v1392_v34 = vadd.f32 1.0, %v1682_v62 }
 0x3ae   : > { %v1686_v40 = vpop.eup %1685  ;;  %v1394_v41 = vadd.f32 1.0, %v1684_v63 }
 0x3af   : > { %1695 = vrcp.f32 %v1392_v34  ;;  %v1688_v0 = vpop.eup %1687  ;;  %v1396_v1 = vadd.f32 1.0, %v1686_v40 }
 0x3b0   : > { %1697 = vrcp.f32 %v1394_v41  ;;  %v1690_v42 = vpop.eup %1689  ;;  %v1395_v33 = vadd.f32 1.0, %v1688_v0 }
 0x3b1   : > { %1699 = vrcp.f32 %v1393_v18  ;;  %v1692_v3 = vpop.eup %1691  ;;  %v1398_v4 = vadd.f32 1.0, %v1690_v42 }
 0x3b2   : > { %1701 = vrcp.f32 %v1396_v1  ;;  %v1397_v5 = vadd.f32 1.0, %v1692_v3  ;;  %v1694_v35 = vpop.eup %1693 }
 0x3b3   : > { %1703 = vrcp.f32 %v1395_v33  ;;  %v1399_v44 = vadd.f32 1.0, %v1694_v35 }
 0x3b4   : > { %1705 = vrcp.f32 %v1398_v4 }
 0x3b5   : > { %1707 = vrcp.f32 %v1397_v5 }
 0x3b6   : > { %1709 = vrcp.f32 %v1399_v44 }
 0x3bc   : > { %v1696_v6 = vpop.eup %1695 }
 0x3bd   : > { %v1698_v7 = vpop.eup %1697  ;;  %1418 = vperm.xlu1 %1662, %v1696_v6  }
 0x3be   : > { %1428 = vperm.xlu0 %1661, %v1698_v7   ;;  %v1700_v36 = vpop.eup %1699 }
 0x3bf   : > { %v1702_v8 = vpop.eup %1701 }
 0x3c0   : > { %v1704_v32 = vpop.eup %1703 }
 0x3c1   : > { %1423 = vperm.xlu1 %1662, %v1700_v36   ;;  %v1706_v46 = vpop.eup %1705 }
 0x3c2   : > { %1438 = vperm.xlu0 %1661, %v1702_v8   ;;  %v1708_v9 = vpop.eup %1707 }
 0x3c3   : > { %v1710_v10 = vpop.eup %1709 }
 0x3c5   : > { %1433 = vperm.xlu1 %1662, %v1704_v32  }
 0x3c6   : > { %1448 = vperm.xlu0 %1661, %v1706_v46  }
 0x3c9   : > { %1443 = vperm.xlu1 %1662, %v1708_v9  }
 0x3cd   : > { %1453 = vperm.xlu1 %1662, %v1710_v10  }
 0x438   : > { %v1419_v11 = vpop.permute.xlu1 %1418 }
 0x439   : > { %v1429_v37 = vpop.permute.xlu0 %1428  ;;  %v1456_v2 = vmul.f32 %v1711_v50, %v1419_v11  ;;  %v1457_v31 = vmul.f32 %v1712_v12, %v1419_v11 }
 0x43a   : > { %v1460_v14 = vmul.f32 %v1713_v13, %v1429_v37  ;;  %v1461_v21 = vmul.f32 %v1714_v38, %v1429_v37 }
 0x43b   : > { %1472 = vst [vmem:[%s2362_s13] sm:$0xff] %v1456_v2  ;;  %1473 = vst [vmem:[%s2362_s13 + $0x8] sm:$0xff] %v1457_v31 }
 0x43c   : > { %1476 = vst [vmem:[%s2362_s13 + $0x20] sm:$0xff] %v1460_v14  ;;  %1477 = vst [vmem:[%s2362_s13 + $0x28] sm:$0xff] %v1461_v21  ;;  %v1424_v15 = vpop.permute.xlu1 %1423 }
 0x43d   : > { %v1439_v48 = vpop.permute.xlu0 %1438  ;;  %v1458_v17 = vmul.f32 %v1715_v16, %v1424_v15  ;;  %v1459_v20 = vmul.f32 %v1716_v19, %v1424_v15 }
 0x43e   : > { %v1464_v26 = vmul.f32 %v1717_v23, %v1439_v48  ;;  %v1465_v28 = vmul.f32 %v1718_v27, %v1439_v48 }
 0x43f   : > { %1474 = vst [vmem:[%s2362_s13 + $0x10] sm:$0xff] %v1458_v17  ;;  %1475 = vst [vmem:[%s2362_s13 + $0x18] sm:$0xff] %v1459_v20 }
 0x440   : > { %1480 = vst [vmem:[%s2362_s13 + $0x40] sm:$0xff] %v1464_v26  ;;  %1481 = vst [vmem:[%s2362_s13 + $0x48] sm:$0xff] %v1465_v28  ;;  %v1434_v39 = vpop.permute.xlu1 %1433 }
 0x441   : > { %v1449_v51 = vpop.permute.xlu0 %1448  ;;  %v1462_v29 = vmul.f32 %v1719_v22, %v1434_v39  ;;  %v1463_v43 = vmul.f32 %v1720_v30, %v1434_v39 }
 0x442   : > { %v1468_v47 = vmul.f32 %v1721_v45, %v1449_v51  ;;  %v1469_v53 = vmul.f32 %v1722_v52, %v1449_v51 }
 0x443   : > { %1478 = vst [vmem:[%s2362_s13 + $0x30] sm:$0xff] %v1462_v29  ;;  %1479 = vst [vmem:[%s2362_s13 + $0x38] sm:$0xff] %v1463_v43 }
 0x444   : > { %1484 = vst [vmem:[%s2362_s13 + $0x60] sm:$0xff] %v1468_v47  ;;  %1485 = vst [vmem:[%s2362_s13 + $0x68] sm:$0xff] %v1469_v53  ;;  %v1444_v54 = vpop.permute.xlu1 %1443 }
 0x445   : > { %v1466_v49 = vmul.f32 %v1723_v55, %v1444_v54  ;;  %v1467_v56 = vmul.f32 %v1724_v24, %v1444_v54 }
 0x447   : > { %1482 = vst [vmem:[%s2362_s13 + $0x50] sm:$0xff] %v1466_v49  ;;  %1483 = vst [vmem:[%s2362_s13 + $0x58] sm:$0xff] %v1467_v56 }
 0x448   : > { %v1454_v57 = vpop.permute.xlu1 %1453 }
 0x449   : > { %v1470_v59 = vmul.f32 %v1725_v58, %v1454_v57  ;;  %v1471_v25 = vmul.f32 %v1726_v60, %v1454_v57 }
 0x44b   : > { %1486 = vst [vmem:[%s2362_s13 + $0x70] sm:$0xff] %v1470_v59  ;;  %1487 = vst [vmem:[%s2362_s13 + $0x78] sm:$0xff] %v1471_v25 }
 0x44c   : > { %1768 = shalt.err (!%p1765_p10)
}
 0x44d   : > { %s1769_s28 = scalar_lea.hbm %s2393_s12, 2048  ;;  %s1773_s10 = scalar_lea.hbm %s2447_s5, 4096 }
 0x44e   : > { %p1770_p0 = scmp.ne.s32.totalorder %s2393_s12, %s1769_s28  ;;  %p1774_p1 = scmp.lt.s32.totalorder %s2393_s12, %s2447_s5 }
 0x44f   : > { %p1775_p3 = scmp.lt.s32.totalorder %s1773_s10, %s1769_s28 }
 0x450   : > { %p1771_p2 = pnand %p1770_p0, %p2456_p12 }
 0x451   : > { %p1776_p6 = por %p1775_p3, %p1774_p1 }
 0x452   : > { %p1772_p9 = pneg %p1771_p2 }
 0x454   : > { %p1777_p11 = pnand %p1776_p6, %p1772_p9 }
 0x456   : > { %1780 = shalt.err (!%p1777_p11)
}
 0x457   : > { %s1826_s17 = smov 256   ;;  %s1827_s26 = smov 16  }
 0x458   : > { %1612 = dma.vmem_to_hbm [thread:$0]  (%p2456_p12), %s2395_s25, 2048, %s2393_s12, %s1489_s22, %s1826_s17, %s1826_s17, %s1827_s26  }
 0x459 PF: > { %s1518_s29 = sand.u32 1, %s1807_s18   ;;  %p2457_p13 = scmp.ne.s32.totalorder %s2453_s6, 0 }
 0x45a   : > { %p2458_p4 = scmp.ge.s32.totalorder %s1819_s21, 2  ;;  %s1519_s14 = scalar_lea.sflag [#allocation4], %s1518_s29 }
 0x45c   : > { %p1619_p5 = pnand %p2458_p4, %p2457_p13 }
 0x45e   : > { %p1620_p7 = pneg %p1619_p5 }
 0x460   : > { %1802 = dma.done.wait (%p1620_p7), %s1519_s14, 2048  }
 0x461   : > { %1804 = vsyncadd (%p1620_p7), %s1519_s14, 4294965248  ;;  %p18_p8 = scmp.ge.s32.totalorder %s1883_s24, 4   ;;  %s2459_s18 = smov %s1811_s19 }
 0x462   : > { %s2460_s19 = smov %s1815_s20  ;;  %s2461_s20 = smov %s1895_s27 }
 0x463   : > { %s2462_s21 = smov %s1883_s24  ;;  %20 = sbr.rel (!%p18_p8) target bundleno = 5 (0x5), region = 85 }
 0x468   :  { %1524 = vsyncpa [#allocation3], 1 }
 0x469   :  { %1526 = vsyncpa [#allocation3 + $0x1], 1 }
 0x46a   :  { %1527 = vsyncpa [#allocation4], 1 }
 0x46b   :  { %1529 = vsyncpa [#allocation4 + $0x1], 1 }

</bundles_post_ra>
